<compile_context>
chip_gen: v6e
topology: v6e:2x2x1
jax: 0.10.0
libtpu: 0.0.40
codegen_flags: <defaults>
</compile_context>

<pallas_src>
import math

import jax
import jax.numpy as jnp
from jax.experimental import pallas as pl
from jax.experimental.pallas import tpu as pltpu

HIDDEN = 256
NUM_CLASSES = 2
LANE = 128
SUBLANE = 8

# VMEM budgeting: tile budget kept well inside v7x's 64 MiB physical VMEM.
VMEM_TILE_BUDGET = 36 * 1024 * 1024
VMEM_LIMIT_BYTES = 48 * 1024 * 1024   # raise scoped limit (default 16/32 MiB)
MAX_BM = 1024


def _round_up(x, m):
    return ((x + m - 1) // m) * m


# ----------------------------- Pallas kernel -----------------------------

def ff_classifier_kernel(x_ref, w1_ref, b1_ref, w2_ref, b2_ref, out_ref):
    """One grid step == one batch tile through the whole MLP.

    x_ref:  (BM, D)        input tile (native dtype; cast to bf16 at the dot)
    w1_ref: (D, 256)  bf16 layer-1 weight, pre-transposed
    b1_ref: (1, 256)  f32  layer-1 bias
    w2_ref: (256,128) bf16 layer-2 weight, pre-transposed + zero-padded from (256,2)
    b2_ref: (1, 128)  f32  layer-2 bias, zero-padded
    out_ref:(BM, 128) f32  logits tile (first 2 lanes valid)
    """
    x = x_ref[...].astype(jnp.bfloat16)
    # Layer 1: Linear -> ReLU (hidden never leaves the kernel).
    h = jnp.dot(x, w1_ref[...], preferred_element_type=jnp.float32) + b1_ref[...]
    h = jnp.maximum(h, 0.0)
    # Dropout is identity at inference time.
    # Layer 2: Linear -> lane-dense padded logits.
    logits = jnp.dot(h.astype(jnp.bfloat16), w2_ref[...],
                     preferred_element_type=jnp.float32) + b2_ref[...]
    out_ref[...] = logits.astype(out_ref.dtype)


# ----------------------------- one-time weight packing -----------------------------

def pack_params(params):
    """Transpose / pad / cast weights ONCE (keep the result resident across calls)."""
    D = params['w1'].shape[1]
    w1t = jnp.asarray(params['w1'], jnp.bfloat16).T                       # (D, 256)
    b1 = jnp.asarray(params['b1'], jnp.float32).reshape(1, HIDDEN)        # (1, 256)
    w2t = jnp.zeros((HIDDEN, LANE), jnp.bfloat16).at[:, :NUM_CLASSES].set(
        jnp.asarray(params['w2'], jnp.bfloat16).T)                        # (256, 128)
    b2 = jnp.zeros((1, LANE), jnp.float32).at[0, :NUM_CLASSES].set(
        jnp.asarray(params['b2'], jnp.float32))                           # (1, 128)
    return dict(w1t=w1t, b1=b1, w2t=w2t, b2=b2, input_dim=D)


# ----------------------------- batch-tile selection -----------------------------

def _choose_bm(B, D, x_itemsize):
    """Pick a batch tile: as large as the VMEM budget allows (capped at MAX_BM)."""
    B8 = _round_up(B, SUBLANE)
    # Resident weight/bias buffers (assume worst-case 2x pipeline buffering).
    const_bytes = 2 * (D * HIDDEN * 2 + HIDDEN * 4 + HIDDEN * LANE * 2 + LANE * 4)
    budget = max(VMEM_TILE_BUDGET - const_bytes, 1 << 20)
    # Per-batch-row bytes: x double-buffer + f32 output double-buffer + f32 hidden.
    per_row = 2 * D * x_itemsize + 2 * LANE * 4 + HIDDEN * 4
    cap = (budget // per_row) // SUBLANE * SUBLANE
    cap = max(SUBLANE, min(MAX_BM, int(cap)))
    if B8 <= cap:
        # Whole batch fits in one tile.  Split into 2 tiles when the batch is big
        # enough so the parallel grid axis can feed both v7x TensorCores.
        if B8 > 256:
            return _round_up((B8 + 1) // 2, SUBLANE)
        return B8
    return cap


# ----------------------------- forward wrapper -----------------------------

def ff_hallucination_classifier(x, packed):
    """x: (B, D) (or (D,)) float32/bfloat16. Returns (B, 2) float32 logits."""
    squeeze_out = False
    if x.ndim == 1:
        x = x[None, :]
        squeeze_out = True

    B, D = x.shape
    assert D == packed['input_dim'], (D, packed['input_dim'])

    BM = _choose_bm(B, D, x.dtype.itemsize)
    grid = (pl.cdiv(B, BM),)

    out = pl.pallas_call(
        ff_classifier_kernel,
        out_shape=jax.ShapeDtypeStruct((B, LANE), jnp.float32),
        grid_spec=pltpu.PrefetchScalarGridSpec(
            num_scalar_prefetch=0,
            grid=grid,
            in_specs=[
                pl.BlockSpec((BM, D), lambda i: (i, 0)),          # x tile
                pl.BlockSpec((D, HIDDEN), lambda i: (0, 0)),      # w1 (resident)
                pl.BlockSpec((1, HIDDEN), lambda i: (0, 0)),      # b1
                pl.BlockSpec((HIDDEN, LANE), lambda i: (0, 0)),   # w2 (resident)
                pl.BlockSpec((1, LANE), lambda i: (0, 0)),        # b2
            ],
            out_specs=pl.BlockSpec((BM, LANE), lambda i: (i, 0)),
        ),
        compiler_params=pltpu.CompilerParams(
            dimension_semantics=("parallel",),
            vmem_limit_bytes=VMEM_LIMIT_BYTES),
    )(x, packed['w1t'], packed['b1'], packed['w2t'], packed['b2'])

    logits = out[:, :NUM_CLASSES]
    return logits[0] if squeeze_out else logits


# ----------------------------- deterministic params -----------------------------

def init_params(key, input_shape):
    k1, k2, k3, k4 = jax.random.split(key, 4)
    bound1 = 1.0 / math.sqrt(input_shape)
    bound2 = 1.0 / math.sqrt(HIDDEN)
    return dict(
        w1=jax.random.uniform(k1, (HIDDEN, input_shape), jnp.float32, -bound1, bound1),
        b1=jax.random.uniform(k2, (HIDDEN,), jnp.float32, -bound1, bound1),
        w2=jax.random.uniform(k3, (NUM_CLASSES, HIDDEN), jnp.float32, -bound2, bound2),
        b2=jax.random.uniform(k4, (NUM_CLASSES,), jnp.float32, -bound2, bound2),
    )


# ----------------------------- pure-JAX reference -----------------------------

def ref_forward(x, params):
    h = jnp.maximum(x.astype(jnp.float32) @ params['w1'].T + params['b1'], 0.0)
    # Dropout is identity at inference.
    return h @ params['w2'].T + params['b2']


# ----------------------------- main -----------------------------

if __name__ == "__main__":
    key = jax.random.PRNGKey(0)
    pkey, xkey1, xkey2 = jax.random.split(key, 3)

    INPUT_SHAPE = 64          # small, deliberately lane-unaligned feature dim

    params = init_params(pkey, INPUT_SHAPE)
    packed = pack_params(params)   # one-time weight packing (transpose + pad + bf16)

    # Small batch: single (padded) tile.
    x_small = jax.random.normal(xkey1, (4, INPUT_SHAPE), jnp.float32)
    out_small = jax.block_until_ready(ff_hallucination_classifier(x_small, packed))
    ref_small = ref_forward(x_small, params)
    assert out_small.shape == (4, NUM_CLASSES), out_small.shape
    assert jnp.allclose(out_small, ref_small, rtol=3e-2, atol=3e-2), (
        f"max abs err {jnp.max(jnp.abs(out_small - ref_small))}")

    # Larger batch: exercises the multi-tile path with a masked edge tile.
    x_big = jax.random.normal(xkey2, (300, INPUT_SHAPE), jnp.float32)
    out_big = jax.block_until_ready(ff_hallucination_classifier(x_big, packed))
    ref_big = ref_forward(x_big, params)
    assert out_big.shape == (300, NUM_CLASSES), out_big.shape
    assert jnp.allclose(out_big, ref_big, rtol=3e-2, atol=3e-2), (
        f"max abs err {jnp.max(jnp.abs(out_big - ref_big))}")

    print("KERNEL_OK")
</pallas_src>

<mosaic_0001>
module attributes {stable_mosaic.version = 11 : i64} {
  func.func @ff_classifier_kernel(%arg0: i32, %arg1: memref<8x64xf32, #tpu.memory_space<vmem>>, %arg2: memref<64x256xbf16, #tpu.memory_space<vmem>>, %arg3: memref<1x256xf32, #tpu.memory_space<vmem>>, %arg4: memref<256x128xbf16, #tpu.memory_space<vmem>>, %arg5: memref<1x128xf32, #tpu.memory_space<vmem>>, %arg6: memref<8x128xf32, #tpu.memory_space<vmem>>) attributes {dimension_semantics = [#tpu.dimension_semantics<parallel>], iteration_bounds = array<i64: 1>, scalar_prefetch = 0 : i64, scratch_operands = 0 : i64, tpu.core_type = #tpu.core_type<tc>, window_params = [{transform_indices = @transform_0, window_bounds = array<i64: 8, 64>}, {pipeline_mode = #tpu.pipeline_mode<synchronous>, transform_indices = @transform_1, window_bounds = array<i64: 64, 256>}, {pipeline_mode = #tpu.pipeline_mode<synchronous>, transform_indices = @transform_2, window_bounds = array<i64: 1, 256>}, {pipeline_mode = #tpu.pipeline_mode<synchronous>, transform_indices = @transform_3, window_bounds = array<i64: 256, 128>}, {pipeline_mode = #tpu.pipeline_mode<synchronous>, transform_indices = @transform_4, window_bounds = array<i64: 1, 128>}, {transform_indices = @transform_5, window_bounds = array<i64: 8, 128>}]} {
    %c0 = arith.constant 0 : index
    %c0_0 = arith.constant 0 : index
    %0 = vector.load %arg1[%c0, %c0_0] : memref<8x64xf32, #tpu.memory_space<vmem>>, vector<8x64xf32>
    %1 = arith.truncf %0 : vector<8x64xf32> to vector<8x64xbf16>
    %c0_1 = arith.constant 0 : index
    %c0_2 = arith.constant 0 : index
    %2 = vector.load %arg2[%c0_1, %c0_2] : memref<64x256xbf16, #tpu.memory_space<vmem>>, vector<64x256xbf16>
    %cst = arith.constant dense<0.000000e+00> : vector<8x256xf32>
    %3 = tpu.matmul %1, %2, %cst {dimension_numbers = #tpu.dot_dimension_numbers<[1], [0], [0], [1], [0, 0, 1, 1], [], []>} : vector<8x64xbf16>, vector<64x256xbf16>, vector<8x256xf32> -> vector<8x256xf32>
    %c0_3 = arith.constant 0 : index
    %c0_4 = arith.constant 0 : index
    %4 = vector.load %arg3[%c0_3, %c0_4] : memref<1x256xf32, #tpu.memory_space<vmem>>, vector<1x256xf32>
    %5 = vector.broadcast %4 : vector<1x256xf32> to vector<8x256xf32>
    %6 = arith.addf %3, %5 : vector<8x256xf32>
    %cst_5 = arith.constant 0.000000e+00 : f32
    %7 = vector.broadcast %cst_5 : f32 to vector<8x256xf32>
    %8 = arith.maximumf %6, %7 : vector<8x256xf32>
    %9 = arith.truncf %8 : vector<8x256xf32> to vector<8x256xbf16>
    %c0_6 = arith.constant 0 : index
    %c0_7 = arith.constant 0 : index
    %10 = vector.load %arg4[%c0_6, %c0_7] : memref<256x128xbf16, #tpu.memory_space<vmem>>, vector<256x128xbf16>
    %cst_8 = arith.constant dense<0.000000e+00> : vector<8x128xf32>
    %11 = tpu.matmul %9, %10, %cst_8 {dimension_numbers = #tpu.dot_dimension_numbers<[1], [0], [0], [1], [0, 0, 1, 1], [], []>} : vector<8x256xbf16>, vector<256x128xbf16>, vector<8x128xf32> -> vector<8x128xf32>
    %c0_9 = arith.constant 0 : index
    %c0_10 = arith.constant 0 : index
    %12 = vector.load %arg5[%c0_9, %c0_10] : memref<1x128xf32, #tpu.memory_space<vmem>>, vector<1x128xf32>
    %13 = vector.broadcast %12 : vector<1x128xf32> to vector<8x128xf32>
    %14 = arith.addf %11, %13 : vector<8x128xf32>
    %c0_11 = arith.constant 0 : index
    %c0_12 = arith.constant 0 : index
    %15 = vector.load %arg6[%c0_11, %c0_12] : memref<8x128xf32, #tpu.memory_space<vmem>>, vector<8x128xf32>
    tpu.vector_store %arg6[%c0_11, %c0_12], %14 {strides = array<i32>} : memref<8x128xf32, #tpu.memory_space<vmem>>, vector<8x128xf32>,
    return
  }
  func.func @transform_0(%arg0: i32) -> (i32, i32) {
    %c0_i32 = arith.constant 0 : i32
    %c0_i32_0 = arith.constant 0 : i32
    return %arg0, %c0_i32 : i32, i32
  }
  func.func @transform_1(%arg0: i32) -> (i32, i32) {
    %c0_i32 = arith.constant 0 : i32
    %c0_i32_0 = arith.constant 0 : i32
    %c0_i32_1 = arith.constant 0 : i32
    return %c0_i32, %c0_i32_0 : i32, i32
  }
  func.func @transform_2(%arg0: i32) -> (i32, i32) {
    %c0_i32 = arith.constant 0 : i32
    %c0_i32_0 = arith.constant 0 : i32
    %c0_i32_1 = arith.constant 0 : i32
    return %c0_i32, %c0_i32_0 : i32, i32
  }
  func.func @transform_3(%arg0: i32) -> (i32, i32) {
    %c0_i32 = arith.constant 0 : i32
    %c0_i32_0 = arith.constant 0 : i32
    %c0_i32_1 = arith.constant 0 : i32
    return %c0_i32, %c0_i32_0 : i32, i32
  }
  func.func @transform_4(%arg0: i32) -> (i32, i32) {
    %c0_i32 = arith.constant 0 : i32
    %c0_i32_0 = arith.constant 0 : i32
    %c0_i32_1 = arith.constant 0 : i32
    return %c0_i32, %c0_i32_0 : i32, i32
  }
  func.func @transform_5(%arg0: i32) -> (i32, i32) {
    %c0_i32 = arith.constant 0 : i32
    %c0_i32_0 = arith.constant 0 : i32
    return %arg0, %c0_i32 : i32, i32
  }
}

</mosaic_0001>

<bundles_post_ra>
// kernel: tpu_custom_call.1
= control target key start
LH: loop header
LB: loop body
LE: loop exit
PB: predicated region body
PF: predicated region fallthrough
CT: control target
= control target key end

     0   :  { %10 = vsyncpa [#allocation3], 0  ;;  %s605_s0 = inlined_call_operand.hbm [shape: f32[4,64], index: 0, kind: input, shape index: {}]   ;;  %s606_s1 = inlined_call_operand.hbm [shape: bf16[64,256], index: 1, kind: input, shape index: {}]   ;;  %s607_s2 = inlined_call_operand.vmem [shape: f32[1,256], index: 2, kind: input, shape index: {}]   ;;  %s608_s3 = inlined_call_operand.hbm [shape: bf16[256,128], index: 3, kind: input, shape index: {}]   ;;  %s609_s4 = inlined_call_operand.vmem [shape: f32[1,128], index: 4, kind: input, shape index: {}]   ;;  %s610_s5 = inlined_call_operand.hbm [shape: f32[4,128], index: 5, kind: output, shape index: {}]  }
   0x1   :  { %11 = vsyncpa [#allocation6], 0 }
   0x2   :  { %12 = vsyncpa [#allocation4], 0 }
   0x3   :  { %17 = vsyncadd [#allocation3], 64  ;;  %s539_s18 = smov [#allocation5]  }
   0x4   :  { %s30_s19 = sshll.u32 %s539_s18, 4  ;;  %s31_s19 = int_to_ptr.vmem [resolvable:$true] %s30_s19 }
   0x5   :  { %s461_s20 = scalar_lea.vmem %s31_s19, 1024  ;;  %p466_p1 = scmp.lt.s32.totalorder %s31_s19, %s31_s19 }
   0x6   :  { %p462_p0 = scmp.ne.s32.totalorder %s31_s19, %s461_s20  ;;  %p467_p2 = scmp.lt.s32.totalorder %s461_s20, %s461_s20 }
   0x8   :  { %p468_p3 = por %p467_p2, %p466_p1 }
   0xa   :  { %p469_p4 = pnand %p468_p3, %p462_p0 }
   0xc   :  { %472 = shalt.err (!%p469_p4)
}
   0xd   :  { %s540_s21 = smov 128   ;;  %s541_s22 = smov 8  }
   0xe   :  { %36 = dma.hbm_to_vmem [thread:$0]  %s606_s1, 1024, %s31_s19, [#allocation6], %s540_s21, %s540_s21, %s541_s22  }
   0xf   :  { %s542_s25 = smov [#allocation2]  }
  0x10   :  { %s18_s26 = sshll.u32 %s542_s25, 4  ;;  %s19_s26 = int_to_ptr.vmem [resolvable:$true] %s18_s26 }
  0x11   :  { %s481_s27 = scalar_lea.vmem %s19_s26, 64  ;;  %s485_s28 = scalar_lea.vmem %s19_s26, 128 }
  0x12   :  { %p482_p5 = scmp.ne.s32.totalorder %s19_s26, %s481_s27  ;;  %p486_p6 = scmp.lt.s32.totalorder %s19_s26, %s19_s26 }
  0x13   :  { %p487_p7 = scmp.lt.s32.totalorder %s485_s28, %s481_s27 }
  0x15   :  { %p488_p8 = por %p487_p7, %p486_p6 }
  0x17   :  { %p489_p9 = pnand %p488_p8, %p482_p5 }
  0x19   :  { %492 = shalt.err (!%p489_p9)
}
  0x1a   :  { %s543_s29 = smov 64   ;;  %s544_s30 = smov 4  }
  0x1b   :  { %24 = dma.hbm_to_vmem [thread:$0]  %s605_s0, 64, %s19_s26, [#allocation3], %s543_s29, %s543_s29, %s544_s30  }
  0x1c   :  { %s545_s1 = smov [#allocation7]  }
  0x1d   :  { %s44_s8 = sshll.u32 %s545_s1, 4  ;;  %s45_s8 = int_to_ptr.vmem [resolvable:$true] %s44_s8 }
  0x1e   :  { %s501_s9 = scalar_lea.vmem %s45_s8, 2048  ;;  %p506_p11 = scmp.lt.s32.totalorder %s45_s8, %s45_s8 }
  0x1f   :  { %p502_p10 = scmp.ne.s32.totalorder %s45_s8, %s501_s9  ;;  %p507_p12 = scmp.lt.s32.totalorder %s501_s9, %s501_s9 }
  0x21   :  { %p508_p13 = por %p507_p12, %p506_p11 }
  0x23   :  { %p509_p0 = pnand %p508_p13, %p502_p10 }
  0x25   :  { %512 = shalt.err (!%p509_p0)
}
  0x26   :  { %50 = dma.hbm_to_vmem [thread:$0]  %s608_s3, 2048, %s45_s8, [#allocation6], %s543_s29, %s543_s29, %s544_s30  }
  0x27   :  { %533 = dma.done.wait [#allocation3], 128  }
  0x28   :  { %534 = vsyncadd [#allocation3], 4294967168 }
  0x29   :  { %535 = dma.done.wait [#allocation6], 3072  }
  0x2a   :  { %536 = vsyncadd [#allocation6], 4294964224  ;;  %v546_v0 = vmov 0   ;;  %v425_v1 = vld [vmem:[#allocation5 + $0x34] ss:$8 sps:$4 sm:$0xff]   ;;  %v441_v13 = vld [vmem:[#allocation7 + $0x68] sm:$0xff]   ;;  %v75_v27 = vlaneseq }
  0x2b   :  { %161 = vmatprep.mubr.bf16.mxu0 %v546_v0  ;;  %v427_v2 = vld [vmem:[#allocation5 + $0x30] ss:$8 sps:$4 sm:$0xff]   ;;  %137 = vmatprep.subr.bf16.mxu0 %v425_v1  ;;  %v428_v3 = vld [vmem:[#allocation5 + $0x24] ss:$8 sps:$4 sm:$0xff]   ;;  %v430_v4 = vld [vmem:[#allocation5 + $0x20] ss:$8 sps:$4 sm:$0xff]  }
  0x2c   :  { %138 = vmatpush1.bf16.msra.mxu0 %v427_v2  ;;  %v431_v5 = vld [vmem:[#allocation5 + $0x14] ss:$8 sps:$4 sm:$0xff]   ;;  %v433_v6 = vld [vmem:[#allocation5 + $0x10] ss:$8 sps:$4 sm:$0xff]   ;;  %v434_v7 = vld [vmem:[#allocation5 + $0x4] ss:$8 sps:$4 sm:$0xff]  }
  0x2d   :  { %139 = vmatprep.subr.bf16.mxu0 %v428_v3  ;;  %v437_v8 = vld [vmem:[#allocation7 + $0x78] sm:$0xff]   ;;  %v439_v10 = vld [vmem:[#allocation7 + $0x70] sm:$0xff]   ;;  %v436_v11 = vld [vmem:[#allocation5] ss:$8 sps:$4 sm:$0xff]   ;;  %vm125_vm0 = vcmask 523264   ;;  %v76_v28 = vshrl.u32 %v75_v27, 7 }
  0x2e   :  { %v438_v9 = vld [vmem:[#allocation7 + $0x38] sm:$0xff]   ;;  %394 = vmatprep.subr.bf16.mxu1 %v437_v8  ;;  %v440_v12 = vld [vmem:[#allocation7 + $0x30] sm:$0xff]   ;;  %v442_v15 = vld [vmem:[#allocation7 + $0x28] sm:$0xff]  }
  0x2f   :  { %395 = vmatpush3.bf16.msra.mxu1 %v438_v9  ;;  %v63_v14 = vld [vmem:[#allocation2] sm:$0xff]  ;;  %v443_v17 = vld [vmem:[#allocation7 + $0x60] sm:$0xff]   ;;  %v447_v21 = vld [vmem:[#allocation7 + $0x50] sm:$0xff]   ;;  %v77_v29 = vsub.s32 0, %v76_v28  ;;  %v81_v31 = vsub.s32 1, %v76_v28 }
  0x30   :  { %140 = vmatpush1.bf16.msra.mxu0 %v430_v4  ;;  %396 = vmatprep.subr.bf16.mxu1 %v439_v10  ;;  %v64_v16 = vpack.c.bf16 %v63_v14, %v63_v14  ;;  %v444_v18 = vld [vmem:[#allocation7 + $0x20] sm:$0xff]   ;;  %v445_v19 = vld [vmem:[#allocation7 + $0x58] sm:$0xff]   ;;  %v448_v22 = vld [vmem:[#allocation7 + $0x10] sm:$0xff]  }
  0x31   :  { %141 = vmatprep.subr.bf16.mxu0 %v431_v5  ;;  %v446_v20 = vld [vmem:[#allocation7 + $0x18] sm:$0xff]   ;;  %v449_v23 = vld [vmem:[#allocation7 + $0x48] sm:$0xff]   ;;  %v451_v25 = vld [vmem:[#allocation7 + $0x40] sm:$0xff]  }
  0x32   :  { %v450_v24 = vld [vmem:[#allocation7 + $0x8] sm:$0xff]   ;;  %v452_v26 = vld [vmem:[#allocation7] sm:$0xff]   ;;  %v73_v30 = vld [vmem:[%s607_s2] sm:$0x3] }
  0x33   :  { %397 = vmatpush3.bf16.msra.mxu1 %v440_v12  ;;  %v78_v32 = vrot.slane %v73_v30, %v77_v29  ;;  %v82_v33 = vrot.slane %v73_v30, %v81_v31  ;;  %v377_v45 = vld [vmem:[%s609_s4] ss:$0 sm:$0xff] }
  0x34   :  { %142 = vmatpush1.bf16.msra.mxu0 %v433_v6  ;;  %398 = vmatprep.subr.bf16.mxu1 %v441_v13 }
  0x35   :  { %143 = vmatprep.subr.bf16.mxu0 %v434_v7 }
  0x37   :  { %399 = vmatpush3.bf16.msra.mxu1 %v442_v15 }
  0x38   :  { %144 = vmatpush1.bf16.msra.mxu0 %v436_v11  ;;  %400 = vmatprep.subr.bf16.mxu1 %v443_v17 }
  0x3b   :  { %376 = vmatmul.mubr.msk.bf16.vlgmr.msra.gmra.mxu0 %vm125_vm0, %v64_v16  ;;  %401 = vmatpush3.bf16.msra.mxu1 %v444_v18 }
  0x3c   :  { %402 = vmatprep.subr.bf16.mxu1 %v445_v19 }
  0x3f   :  { %403 = vmatpush3.bf16.msra.mxu1 %v446_v20 }
  0x40   :  { %404 = vmatprep.subr.bf16.mxu1 %v447_v21 }
  0x43   :  { %405 = vmatpush3.bf16.msra.mxu1 %v448_v22 }
  0x44   :  { %406 = vmatprep.subr.bf16.mxu1 %v449_v23 }
  0x47   :  { %407 = vmatpush3.bf16.msra.mxu1 %v450_v24 }
  0x48   :  { %408 = vmatprep.subr.bf16.mxu1 %v451_v25 }
  0x4b   :  { %409 = vmatpush3.bf16.msra.mxu1 %v452_v26 }
  0xfb   :  { %v163_v34 = vpop.f32.mrf.mxu0 }
  0xfc   :  { %v164_v35 = vadd.f32 %v163_v34, %v78_v32 }
  0xfd   :  { %v165_v36 = vpop.f32.mrf.mxu0 }
  0xfe   :  { %v166_v37 = vadd.f32 %v165_v36, %v82_v33  ;;  %v170_v38 = vmax.f32 %v164_v35, 0.0 }
  0xff   :  { %v167_v39 = vpop.f32.mrf.mxu0 }
 0x100   :  { %v171_v40 = vmax.f32 %v166_v37, 0.0  ;;  %v172_v43 = vpack.c.bf16 %v170_v38, %v170_v38 }
 0x101   :  { %v168_v41 = vpop.f32.mrf.mxu0 }
 0x102   :  { %v173_v42 = vpack.c.bf16 %v171_v40, %v171_v40 }
 0x104   :  { %341 = vmatprep.mubr.bf16.mxu1 %v173_v42 }
 0x105   :  { %342 = vmatmul.mubr.bf16.vlgmr.msra.gmra.mxu1 %v172_v43 }
 0x1c5   :  { %v410_v44 = vpop.f32.mrf.mxu1 }
 0x1c7   :  { %v411_v46 = vpop.f32.mrf.mxu1 }
 0x1c8   :  { %v412_v47 = vadd.f32 %v411_v46, %v410_v44 }
 0x1c9   :  { %v413_v48 = vpop.f32.mrf.mxu1 }
 0x1ca   :  { %v344_v49 = vadd.f32 %v412_v47, %v377_v45 }
 0x1cb   :  { %v414_v50 = vpop.f32.mrf.mxu1 }
 0x1cc   :  { %349 = vst [vmem:[#allocation8] sm:$0xff] %v344_v49 }
 0x1cd   :  { %354 = vsyncadd [#allocation4], 64  ;;  %s547_s2 = smov [#allocation8]  }
 0x1ce   :  { %s355_s14 = sshll.u32 %s547_s2, 4  ;;  %s356_s14 = int_to_ptr.vmem [resolvable:$true] %s355_s14 }
 0x1cf   :  { %s513_s15 = scalar_lea.vmem %s356_s14, 64  ;;  %s517_s16 = scalar_lea.vmem %s356_s14, 128 }
 0x1d0   :  { %p514_p1 = scmp.ne.s32.totalorder %s356_s14, %s513_s15  ;;  %p518_p2 = scmp.lt.s32.totalorder %s356_s14, %s356_s14 }
 0x1d1   :  { %p519_p3 = scmp.lt.s32.totalorder %s517_s16, %s513_s15 }
 0x1d3   :  { %p520_p4 = por %p519_p3, %p518_p2 }
 0x1d5   :  { %p521_p5 = pnand %p520_p4, %p514_p1 }
 0x1d7   :  { %524 = shalt.err (!%p521_p5)
}
 0x1d8   :  { %361 = dma.vmem_to_hbm [thread:$0]  %s356_s14, 64, %s610_s5, [#allocation4], %s543_s29, %s543_s29, %s544_s30  }
 0x1d9   :  { %537 = dma.done.wait [#allocation4], 128  }
 0x1da   :  { %538 = vsyncadd [#allocation4], 4294967168 }
 0x1db   :  { %365 = vsyncpa [#allocation3], 1 }
 0x1dc   :  { %366 = vsyncpa [#allocation6], 1 }
 0x1dd   :  { %367 = vsyncpa [#allocation4], 1 }

</bundles_post_ra>
